<compile_context>
chip_gen: v6e
topology: v6e:2x2x1
jax: 0.10.0
libtpu: 0.0.40
codegen_flags: <defaults>
</compile_context>

<pallas_src>
import functools

import jax
import jax.numpy as jnp
from jax.experimental import pallas as pl
from jax.experimental.pallas import tpu as pltpu


# ---------------------------------------------------------------------------
# Pass 1: per-core partial sums of tanh(fc(h)) over nodes, per meta-path.
#   s_ref block (1, M, d) accumulates sum_n tanh(h[n, m] @ W^T + b).
# ---------------------------------------------------------------------------
def _fc_tanh_sum_kernel(h_ref, wt_ref, b_ref, s_ref, *,
                        M, d, n_valid, tn, steps, n_tiles, has_tail):
    c = pl.program_id(0)          # partial-sum group (per core)
    i = pl.program_id(1)          # node-tile step    (reduction axis)

    @pl.when(i == 0)
    def _():
        s_ref[...] = jnp.zeros_like(s_ref)

    tile_idx = c * steps + i
    hv = h_ref[...]               # (tn, M*d)
    wt = wt_ref[...]              # (d, d)   resident
    b = b_ref[...]                # (1, d)   resident, f32

    def accumulate(mask_rows):
        if mask_rows:
            base = tile_idx * tn
            row = jax.lax.broadcasted_iota(jnp.int32, (tn, 1), 0) + base
            keep = row < n_valid                                   # (tn, 1) bool
        parts = []
        for m in range(M):
            x = hv[:, m * d:(m + 1) * d]                           # (tn, d)
            t = jnp.tanh(
                jnp.dot(x, wt, preferred_element_type=jnp.float32) + b)
            if mask_rows:
                t = jnp.where(keep, t, 0.0)                        # NaN-safe mask
            parts.append(jnp.sum(t, axis=0, keepdims=True))        # (1, d)
        s_ref[...] += jnp.concatenate(parts, axis=0)[None]         # (1, M, d)

    if has_tail:
        is_tail = tile_idx >= n_tiles - 1

        @pl.when(is_tail)
        def _():
            accumulate(True)

        @pl.when(jnp.logical_not(is_tail))
        def _():
            accumulate(False)
    else:
        accumulate(False)


# ---------------------------------------------------------------------------
# Pass 2: out_tile = sum_m beta[m] * h_tile[:, m*d:(m+1)*d]   (pure VPU)
#   brow is the f32 beta row repeated d times per meta-path: (1, M*d).
# ---------------------------------------------------------------------------
def _weighted_sum_kernel(h_ref, brow_ref, o_ref, *, M, d):
    w = h_ref[...].astype(jnp.float32) * brow_ref[...]             # (tn, M*d) f32
    acc = w[:, :d]
    for m in range(1, M):
        acc = acc + w[:, m * d:(m + 1) * d]
    # NOTE: for d < 128 the output store is lane-partial; writes are only 1/M
    # of the traffic here so we leave it un-packed.
    o_ref[...] = acc.astype(o_ref.dtype)


# ---------------------------------------------------------------------------
# Wrapper
# ---------------------------------------------------------------------------
def _vmem_capacity_bytes():
    try:
        return int(pltpu.get_tpu_info().vmem_capacity_bytes)
    except Exception:
        return 64 << 20          # conservative (v7x per-TC VMEM)


def _pick_tile(n, md, itemsize, vmem_limit, *, max_rows=4096):
    """Largest multiple-of-8 node tile whose working set fits the budget.

    Per row: double-buffered streamed tile (2 * md * itemsize) plus one f32
    intermediate of the same width (md * 4).
    """
    per_row = md * (2 * itemsize + 4)
    budget = vmem_limit // 3
    tn = max(8, budget // max(1, per_row))
    tn = max(8, min(max_rows, (tn // 8) * 8))
    n_rounded = ((n + 7) // 8) * 8
    return min(tn, n_rounded)


def semantic_attention(h, fc_w, fc_b, attn, *, num_cores=1):
    """h: (N, M, d); fc_w: (d, d) [PyTorch (out,in)]; fc_b: (d,) or (1,d); attn: (1, d).

    num_cores: set to 2 on multi-TensorCore chips (v7x) to split the pass-1
    reduction across cores (CORE_PARALLEL). Default 1 is correct everywhere.
    """
    N, M, d = h.shape
    dtype = h.dtype
    md = M * d
    f32 = jnp.float32

    # Lane-dense view: (N, M, d) -> (N, M*d).  Free row-major reshape, no copy.
    h2 = h.reshape(N, md)

    cap = _vmem_capacity_bytes()
    vmem_limit = int(max(min(cap - (12 << 20), 100 << 20), 32 << 20))

    itemsize = jnp.dtype(dtype).itemsize
    tn = _pick_tile(N, md, itemsize, vmem_limit)

    n_tiles = -(-N // tn)                        # cdiv
    p = max(1, min(num_cores, n_tiles))          # partial-sum groups
    steps = -(-n_tiles // p)
    has_tail = (p * steps * tn != N)             # tail tile needs row masking

    # Small resident operands.
    wt = fc_w.T.astype(dtype)                    # (d, d)
    bias = fc_b.reshape(1, d).astype(f32)        # (1, d)

    if p > 1:
        sem1 = (pltpu.CORE_PARALLEL, "arbitrary")
    else:
        sem1 = ("arbitrary", "arbitrary")

    # -------- pass 1: per-core, per-meta-path partial sums of tanh(fc(h)) ----
    s_part = pl.pallas_call(
        functools.partial(_fc_tanh_sum_kernel, M=M, d=d, n_valid=N, tn=tn,
                          steps=steps, n_tiles=n_tiles, has_tail=has_tail),
        out_shape=jax.ShapeDtypeStruct((p, M, d), f32),
        grid_spec=pltpu.PrefetchScalarGridSpec(
            num_scalar_prefetch=0,
            grid=(p, steps),
            in_specs=[
                # h tile; clamp keeps any over-run tile's DMA in bounds
                # (its rows are then fully masked by the row < N check).
                pl.BlockSpec((tn, md),
                             lambda c, i: (jnp.minimum(c * steps + i,
                                                       n_tiles - 1), 0)),
                pl.BlockSpec((d, d), lambda c, i: (0, 0)),    # W^T   (resident)
                pl.BlockSpec((1, d), lambda c, i: (0, 0)),    # bias  (resident)
            ],
            out_specs=pl.BlockSpec((1, M, d), lambda c, i: (c, 0, 0)),
        ),
        compiler_params=pltpu.CompilerParams(
            dimension_semantics=sem1,
            vmem_limit_bytes=vmem_limit),
    )(h2, wt, bias)

    # -------- tiny glue math (M*d elems), once, in plain JAX -----------------
    # TODO(synk): attn_drop is eval-mode identity here (no dropout mask path).
    s = s_part.sum(axis=0).astype(f32) / N                   # (M, d)  == mean
    w = s @ attn.astype(f32).T                               # (M, 1)
    beta = jax.nn.softmax(w, axis=0)                         # (M, 1), kept f32
    brow = jnp.repeat(beta.reshape(M), d).reshape(1, md).astype(f32)  # (1, M*d)

    # -------- pass 2: streaming per-meta-path weighted sum (VPU only) --------
    out = pl.pallas_call(
        functools.partial(_weighted_sum_kernel, M=M, d=d),
        out_shape=jax.ShapeDtypeStruct((N, d), dtype),
        grid_spec=pltpu.PrefetchScalarGridSpec(
            num_scalar_prefetch=0,
            grid=(n_tiles,),
            in_specs=[
                pl.BlockSpec((tn, md), lambda i: (i, 0)),     # h tile
                pl.BlockSpec((1, md), lambda i: (0, 0)),      # beta row (resident)
            ],
            out_specs=pl.BlockSpec((tn, d), lambda i: (i, 0)),
        ),
        compiler_params=pltpu.CompilerParams(
            dimension_semantics=("parallel",),
            vmem_limit_bytes=vmem_limit),
    )(h2, brow)

    return out


# ---------------------------------------------------------------------------
# Parameter init + pure-JAX reference (mirrors the PyTorch module)
# ---------------------------------------------------------------------------
def init_params(key, d):
    """Deterministic init matching the PyTorch module's reset_parameters()."""
    k1, k2, k3 = jax.random.split(key, 3)
    gain = jnp.sqrt(2.0)                               # calculate_gain('relu')
    std_w = gain * jnp.sqrt(2.0 / (d + d))             # xavier_normal_ on (d, d)
    fc_w = std_w * jax.random.normal(k1, (d, d), jnp.float32)
    bound = 1.0 / jnp.sqrt(d)                          # nn.Linear default bias init
    fc_b = jax.random.uniform(k2, (1, d), jnp.float32, -bound, bound)
    std_a = gain * jnp.sqrt(2.0 / (1 + d))             # xavier_normal_ on (1, d)
    attn = std_a * jax.random.normal(k3, (1, d), jnp.float32)
    return fc_w, fc_b, attn


def reference(h, fc_w, fc_b, attn):
    """Pure-JAX reference (mirrors the PyTorch forward)."""
    t = jnp.tanh(jnp.einsum("nmd,ed->nme", h, fc_w) + fc_b[None])  # fc + tanh
    s = t.mean(axis=0)                                             # (M, d)
    w = s @ attn.T                                                 # (M, 1)
    beta = jax.nn.softmax(w, axis=0)                               # (M, 1)
    return jnp.sum(beta[None, :, :] * h, axis=1)                   # (N, d)


if __name__ == "__main__":
    key = jax.random.PRNGKey(0)
    kh, kp = jax.random.split(key)

    N, M, d = 64, 4, 32                                # small synthetic shapes
    h = jax.random.normal(kh, (N, M, d), jnp.float32)
    fc_w, fc_b, attn = init_params(kp, d)

    out = semantic_attention(h, fc_w, fc_b, attn)
    out = jax.block_until_ready(out)

    ref = reference(h, fc_w, fc_b, attn)
    assert out.shape == (N, d)
    assert jnp.allclose(out, ref, atol=1e-4, rtol=1e-4), "kernel/reference mismatch"
    print("KERNEL_OK")
</pallas_src>

<mosaic_0001>
module attributes {stable_mosaic.version = 11 : i64} {
  func.func @_fc_tanh_sum_kernel(%arg0: i32, %arg1: i32, %arg2: memref<64x128xf32, #tpu.memory_space<vmem>>, %arg3: memref<32x32xf32, #tpu.memory_space<vmem>>, %arg4: memref<1x32xf32, #tpu.memory_space<vmem>>, %arg5: memref<1x4x32xf32, #tpu.memory_space<vmem>>) attributes {dimension_semantics = [#tpu.dimension_semantics<arbitrary>, #tpu.dimension_semantics<arbitrary>], iteration_bounds = array<i64: 1, 1>, scalar_prefetch = 0 : i64, scratch_operands = 0 : i64, tpu.core_type = #tpu.core_type<tc>, window_params = [{transform_indices = @transform_0, window_bounds = array<i64: 64, 128>}, {pipeline_mode = #tpu.pipeline_mode<synchronous>, transform_indices = @transform_1, window_bounds = array<i64: 32, 32>}, {pipeline_mode = #tpu.pipeline_mode<synchronous>, transform_indices = @transform_2, window_bounds = array<i64: 1, 32>}, {transform_indices = @transform_3, window_bounds = array<i64: 1, 4, 32>}]} {
    %c0_i32 = arith.constant 0 : i32
    %0 = arith.cmpi eq, %arg1, %c0_i32 : i32
    %1 = arith.extui %0 : i1 to i32
    %c0_i32_0 = arith.constant 0 : i32
    %2 = arith.cmpi ne, %1, %c0_i32_0 : i32
    scf.if %2 {
      %cst_19 = arith.constant 0.000000e+00 : f32
      %39 = vector.broadcast %cst_19 : f32 to vector<1x4x32xf32>
      %c0_20 = arith.constant 0 : index
      %c0_21 = arith.constant 0 : index
      %c0_22 = arith.constant 0 : index
      %40 = vector.load %arg5[%c0_20, %c0_21, %c0_22] : memref<1x4x32xf32, #tpu.memory_space<vmem>>, vector<1x4x32xf32>
      tpu.vector_store %arg5[%c0_20, %c0_21, %c0_22], %39 {strides = array<i32>} : memref<1x4x32xf32, #tpu.memory_space<vmem>>, vector<1x4x32xf32>,
    } else {
    }
    %c0 = arith.constant 0 : index
    %c0_1 = arith.constant 0 : index
    %3 = vector.load %arg2[%c0, %c0_1] : memref<64x128xf32, #tpu.memory_space<vmem>>, vector<64x128xf32>
    %c0_2 = arith.constant 0 : index
    %c0_3 = arith.constant 0 : index
    %4 = vector.load %arg3[%c0_2, %c0_3] : memref<32x32xf32, #tpu.memory_space<vmem>>, vector<32x32xf32>
    %c0_4 = arith.constant 0 : index
    %c0_5 = arith.constant 0 : index
    %5 = vector.load %arg4[%c0_4, %c0_5] : memref<1x32xf32, #tpu.memory_space<vmem>>, vector<1x32xf32>
    %6 = vector.extract_strided_slice %3 {offsets = [0, 0], sizes = [64, 32], strides = [1, 1]} : vector<64x128xf32> to vector<64x32xf32>
    %cst = arith.constant dense<0.000000e+00> : vector<64x32xf32>
    %7 = tpu.matmul %6, %4, %cst {dimension_numbers = #tpu.dot_dimension_numbers<[1], [0], [0], [1], [0, 0, 1, 1], [], []>} : vector<64x32xf32>, vector<32x32xf32>, vector<64x32xf32> -> vector<64x32xf32>
    %8 = vector.broadcast %5 : vector<1x32xf32> to vector<64x32xf32>
    %9 = arith.addf %7, %8 : vector<64x32xf32>
    %10 = math.tanh %9 : vector<64x32xf32>
    %cst_6 = arith.constant dense<0.000000e+00> : vector<32xf32>
    %11 = vector.multi_reduction <add>, %10, %cst_6 [0] : vector<64x32xf32> to vector<32xf32>
    %12 = vector.shape_cast %11 : vector<32xf32> to vector<1x32xf32>
    %13 = vector.extract_strided_slice %3 {offsets = [0, 32], sizes = [64, 32], strides = [1, 1]} : vector<64x128xf32> to vector<64x32xf32>
    %cst_7 = arith.constant dense<0.000000e+00> : vector<64x32xf32>
    %14 = tpu.matmul %13, %4, %cst_7 {dimension_numbers = #tpu.dot_dimension_numbers<[1], [0], [0], [1], [0, 0, 1, 1], [], []>} : vector<64x32xf32>, vector<32x32xf32>, vector<64x32xf32> -> vector<64x32xf32>
    %15 = vector.broadcast %5 : vector<1x32xf32> to vector<64x32xf32>
    %16 = arith.addf %14, %15 : vector<64x32xf32>
    %17 = math.tanh %16 : vector<64x32xf32>
    %cst_8 = arith.constant dense<0.000000e+00> : vector<32xf32>
    %18 = vector.multi_reduction <add>, %17, %cst_8 [0] : vector<64x32xf32> to vector<32xf32>
    %19 = vector.shape_cast %18 : vector<32xf32> to vector<1x32xf32>
    %20 = vector.extract_strided_slice %3 {offsets = [0, 64], sizes = [64, 32], strides = [1, 1]} : vector<64x128xf32> to vector<64x32xf32>
    %cst_9 = arith.constant dense<0.000000e+00> : vector<64x32xf32>
    %21 = tpu.matmul %20, %4, %cst_9 {dimension_numbers = #tpu.dot_dimension_numbers<[1], [0], [0], [1], [0, 0, 1, 1], [], []>} : vector<64x32xf32>, vector<32x32xf32>, vector<64x32xf32> -> vector<64x32xf32>
    %22 = vector.broadcast %5 : vector<1x32xf32> to vector<64x32xf32>
    %23 = arith.addf %21, %22 : vector<64x32xf32>
    %24 = math.tanh %23 : vector<64x32xf32>
    %cst_10 = arith.constant dense<0.000000e+00> : vector<32xf32>
    %25 = vector.multi_reduction <add>, %24, %cst_10 [0] : vector<64x32xf32> to vector<32xf32>
    %26 = vector.shape_cast %25 : vector<32xf32> to vector<1x32xf32>
    %27 = vector.extract_strided_slice %3 {offsets = [0, 96], sizes = [64, 32], strides = [1, 1]} : vector<64x128xf32> to vector<64x32xf32>
    %cst_11 = arith.constant dense<0.000000e+00> : vector<64x32xf32>
    %28 = tpu.matmul %27, %4, %cst_11 {dimension_numbers = #tpu.dot_dimension_numbers<[1], [0], [0], [1], [0, 0, 1, 1], [], []>} : vector<64x32xf32>, vector<32x32xf32>, vector<64x32xf32> -> vector<64x32xf32>
    %29 = vector.broadcast %5 : vector<1x32xf32> to vector<64x32xf32>
    %30 = arith.addf %28, %29 : vector<64x32xf32>
    %31 = math.tanh %30 : vector<64x32xf32>
    %cst_12 = arith.constant dense<0.000000e+00> : vector<32xf32>
    %32 = vector.multi_reduction <add>, %31, %cst_12 [0] : vector<64x32xf32> to vector<32xf32>
    %33 = vector.shape_cast %32 : vector<32xf32> to vector<1x32xf32>
    %c0_13 = arith.constant 0 : index
    %c0_14 = arith.constant 0 : index
    %c0_15 = arith.constant 0 : index
    %34 = vector.load %arg5[%c0_13, %c0_14, %c0_15] : memref<1x4x32xf32, #tpu.memory_space<vmem>>, vector<1x4x32xf32>
    %35 = tpu.concatenate %12, %19, %26, %33 in 0 : vector<1x32xf32>, vector<1x32xf32>, vector<1x32xf32>, vector<1x32xf32> -> vector<4x32xf32>
    %36 = vector.shape_cast %35 : vector<4x32xf32> to vector<1x4x32xf32>
    %37 = arith.addf %34, %36 : vector<1x4x32xf32>
    %c0_16 = arith.constant 0 : index
    %c0_17 = arith.constant 0 : index
    %c0_18 = arith.constant 0 : index
    %38 = vector.load %arg5[%c0_16, %c0_17, %c0_18] : memref<1x4x32xf32, #tpu.memory_space<vmem>>, vector<1x4x32xf32>
    tpu.vector_store %arg5[%c0_16, %c0_17, %c0_18], %37 {strides = array<i32>} : memref<1x4x32xf32, #tpu.memory_space<vmem>>, vector<1x4x32xf32>,
    return
  }
  func.func @transform_0(%arg0: i32, %arg1: i32) -> (i32, i32) {
    %c1_i32 = arith.constant 1 : i32
    %0 = arith.muli %arg0, %c1_i32 : i32
    %1 = arith.addi %0, %arg1 : i32
    %c0_i32 = arith.constant 0 : i32
    %2 = arith.minsi %1, %c0_i32 : i32
    %c0_i32_0 = arith.constant 0 : i32
    %c0_i32_1 = arith.constant 0 : i32
    return %2, %c0_i32_0 : i32, i32
  }
  func.func @transform_1(%arg0: i32, %arg1: i32) -> (i32, i32) {
    %c0_i32 = arith.constant 0 : i32
    %c0_i32_0 = arith.constant 0 : i32
    %c0_i32_1 = arith.constant 0 : i32
    return %c0_i32, %c0_i32_0 : i32, i32
  }
  func.func @transform_2(%arg0: i32, %arg1: i32) -> (i32, i32) {
    %c0_i32 = arith.constant 0 : i32
    %c0_i32_0 = arith.constant 0 : i32
    %c0_i32_1 = arith.constant 0 : i32
    return %c0_i32, %c0_i32_0 : i32, i32
  }
  func.func @transform_3(%arg0: i32, %arg1: i32) -> (i32, i32, i32) {
    %c0_i32 = arith.constant 0 : i32
    %c0_i32_0 = arith.constant 0 : i32
    %c0_i32_1 = arith.constant 0 : i32
    return %arg0, %c0_i32, %c0_i32_0 : i32, i32, i32
  }
}

</mosaic_0001>

<bundles_post_ra>
// kernel: tpu_custom_call.1
= control target key start
LH: loop header
LB: loop body
LE: loop exit
PB: predicated region body
PF: predicated region fallthrough
CT: control target
= control target key end

     0   :  { %8 = vsyncpa [#allocation3], 0  ;;  %s1252_s0 = inlined_call_operand.hbm [shape: f32[64,128], index: 0, kind: input, shape index: {}]   ;;  %s1253_s1 = inlined_call_operand.hbm [shape: f32[32,32], index: 1, kind: input, shape index: {}]   ;;  %s1254_s2 = inlined_call_operand.vmem [shape: f32[1,32], index: 2, kind: input, shape index: {}]   ;;  %s1255_s3 = inlined_call_operand.hbm [shape: f32[1,4,32], index: 3, kind: output, shape index: {}]  }
   0x1   :  { %9 = vsyncpa [#allocation6], 0 }
   0x2   :  { %10 = vsyncpa [#allocation4], 0  ;;  %s1063_s12 = smov [#allocation2]  }
   0x3   :  { %s22_s13 = sshll.u32 %s1063_s12, 4  ;;  %s23_s13 = int_to_ptr.vmem [resolvable:$true] %s22_s13 }
   0x4   :  { %s1005_s14 = scalar_lea.vmem %s23_s13, 1024  ;;  %p1010_p1 = scmp.lt.s32.totalorder %s23_s13, %s23_s13 }
   0x5   :  { %p1006_p0 = scmp.ne.s32.totalorder %s23_s13, %s1005_s14  ;;  %p1011_p2 = scmp.lt.s32.totalorder %s1005_s14, %s1005_s14 }
   0x7   :  { %p1012_p3 = por %p1011_p2, %p1010_p1 }
   0x9   :  { %p1013_p4 = pnand %p1012_p3, %p1006_p0 }
   0xb   :  { %1016 = shalt.err (!%p1013_p4)
}
   0xc   :  { %s1064_s15 = smov 128   ;;  %s1065_s16 = smov 8  }
   0xd   :  { %28 = dma.hbm_to_vmem [thread:$0]  %s1252_s0, 1024, %s23_s13, [#allocation3], %s1064_s15, %s1064_s15, %s1065_s16  }
   0xe   :  { %s1066_s19 = smov [#allocation5]  }
   0xf   :  { %s34_s20 = sshll.u32 %s1066_s19, 4  ;;  %s35_s20 = int_to_ptr.vmem [resolvable:$true] %s34_s20 }
  0x10   :  { %s1025_s21 = scalar_lea.vmem %s35_s20, 512  ;;  %p1030_p6 = scmp.lt.s32.totalorder %s35_s20, %s35_s20 }
  0x11   :  { %p1026_p5 = scmp.ne.s32.totalorder %s35_s20, %s1025_s21  ;;  %p1031_p7 = scmp.lt.s32.totalorder %s1025_s21, %s1025_s21 }
  0x13   :  { %p1032_p8 = por %p1031_p7, %p1030_p6 }
  0x15   :  { %p1033_p9 = pnand %p1032_p8, %p1026_p5 }
  0x17   :  { %1036 = shalt.err (!%p1033_p9)
}
  0x18   :  { %40 = dma.hbm_to_vmem [thread:$0]  %s1253_s1, 512, %s35_s20, [#allocation6], %s1064_s15, %s1064_s15, %s1065_s16  }
  0x19   :  { %1057 = dma.done.wait [#allocation3], 1024  }
  0x1a   :  { %1058 = vsyncadd [#allocation3], 4294966272 }
  0x1b   :  { %1059 = dma.done.wait [#allocation6], 512  }
  0x1c   :  { %1060 = vsyncadd [#allocation6], 4294966784  ;;  %vm78_vm0 = vcmask 261120   ;;  %v59_v0 = vld [vmem:[#allocation2] sm:$0xff]  ;;  %v61_v1 = vld [vmem:[#allocation2 + $0x10] sm:$0xff]  ;;  %s1067_s0 = smov 96  }
  0x1d   :  { %237 = vrot.lane.b32.xlu0 %v59_v0, %s1067_s0  ;;  %241 = vrot.lane.b32.xlu1 %v61_v1, %s1067_s0  ;;  %v60_v2 = vld [vmem:[#allocation2 + $0x8] sm:$0xff]  ;;  %v62_v3 = vld [vmem:[#allocation2 + $0x18] sm:$0xff]  ;;  %v1104_v5 = vld [vmem:[#allocation5 + $0x10] sm:$0xff]  ;;  %s1068_s1 = smov 64   ;;  %s1069_s24 = smov 32   ;;  %vm57_vm1 = vcmask 257024  }
  0x1e   :  { %v1100_v4 = vld [vmem:[#allocation5 + $0x18] sm:$0xff]  ;;  %852 = vmatprep.mubr.msk.f32.mxu0 %vm78_vm0, %v59_v0  ;;  %v1111_v6 = vld [vmem:[#allocation5 + $0x8] sm:$0xff]  ;;  %v63_v7 = vld [vmem:[#allocation2 + $0x20] sm:$0xff]  ;;  %v1070_v36 = vmov 0.0   ;;  %vm736_vm2 = vcmask 1040384   ;;  %vm738_vm3 = vcmask 1041408  }
  0x1f   :  { %844 = vmatprep.subr.mxu0 %v1100_v4  ;;  %864 = vmatprep.subr.mxu1 %v1100_v4  ;;  %v64_v8 = vld [vmem:[#allocation2 + $0x28] sm:$0xff]  ;;  %v1118_v9 = vld [vmem:[#allocation5] sm:$0xff]  ;;  %v65_v10 = vld [vmem:[#allocation2 + $0x30] sm:$0xff]  ;;  %58 = vst.msk [vmem:[#allocation7] sm:$0xf] %vm57_vm1, %v1070_v36  ;;  %vm740_vm4 = vcmask 1042432  }
  0x20   :  { %845 = vmatpush3.msra.mxu0 %v1100_v4  ;;  %865 = vmatpush3.msra.mxu1 %v1100_v4  ;;  %v66_v11 = vld [vmem:[#allocation2 + $0x38] sm:$0xff]  ;;  %v1182_v41 = vld [vmem:[%s1254_s2] ss:$0 sm:$0xff]  ;;  %s1071_s2 = smov [#allocation7]  }
  0x21   :  { %239 = vrot.lane.b32.xlu0 %v60_v2, %s1067_s0  ;;  %243 = vrot.lane.b32.xlu1 %v62_v3, %s1067_s0  ;;  %s751_s27 = sshll.u32 %s1071_s2, 4  ;;  %s752_s27 = int_to_ptr.vmem [resolvable:$true] %s751_s27 }
  0x22   :  { %846 = vmatprep.subr.mxu0 %v1104_v5  ;;  %866 = vmatprep.subr.mxu1 %v1104_v5  ;;  %s1037_s28 = scalar_lea.vmem %s752_s27, 64  ;;  %p1042_p11 = scmp.lt.s32.totalorder %s752_s27, %s752_s27 }
  0x23   :  { %847 = vmatpush3.msra.mxu0 %v1104_v5  ;;  %867 = vmatpush3.msra.mxu1 %v1104_v5  ;;  %p1038_p10 = scmp.ne.s32.totalorder %s752_s27, %s1037_s28  ;;  %p1043_p12 = scmp.lt.s32.totalorder %s1037_s28, %s1037_s28 }
  0x24   :  { %848 = vmatprep.subr.mxu0 %v1111_v6  ;;  %868 = vmatprep.subr.mxu1 %v1111_v6 }
  0x25   :  { %245 = vrot.lane.b32.xlu0 %v63_v7, %s1067_s0  ;;  %247 = vrot.lane.b32.xlu1 %v64_v8, %s1067_s0  ;;  %p1044_p13 = por %p1043_p12, %p1042_p11 }
  0x26   :  { %849 = vmatpush3.msra.mxu0 %v1111_v6  ;;  %869 = vmatpush3.msra.mxu1 %v1111_v6 }
  0x27   :  { %850 = vmatprep.subr.mxu0 %v1118_v9  ;;  %870 = vmatprep.subr.mxu1 %v1118_v9  ;;  %p1045_p0 = pnand %p1044_p13, %p1038_p10 }
  0x28   :  { %851 = vmatpush3.msra.mxu0 %v1118_v9  ;;  %871 = vmatpush3.msra.mxu1 %v1118_v9 }
  0x29   :  { %249 = vrot.lane.b32.xlu0 %v65_v10, %s1067_s0  ;;  %251 = vrot.lane.b32.xlu1 %v66_v11, %s1067_s0 }
  0x2a   :  { %853 = vmatmul.mubr.msk.f32.vlgmr.msra.gmra.mxu0 %vm78_vm0, %v60_v2  ;;  %884 = vmatprep.subr.mxu0 %v1100_v4 }
  0x2b   :  { %855 = vmatprep.mubr.msk.f32.mxu0 %vm78_vm0, %v61_v1  ;;  %885 = vmatpush3.msra.mxu0 %v1100_v4 }
  0x2c   :  { %886 = vmatprep.subr.mxu0 %v1104_v5  ;;  %904 = vmatprep.subr.mxu1 %v1100_v4 }
  0x2d   :  { %403 = vrot.lane.b32.xlu0 %v59_v0, %s1068_s1  ;;  %405 = vrot.lane.b32.xlu1 %v60_v2, %s1068_s1 }
  0x2e   :  { %856 = vmatmul.mubr.msk.f32.gmra.mxu0 %vm78_vm0, %v62_v3 }
  0x2f   :  { %858 = vmatprep.mubr.msk.f32.mxu0 %vm78_vm0, %v63_v7  ;;  %887 = vmatpush3.msra.mxu0 %v1104_v5 }
  0x30   :  { %888 = vmatprep.subr.mxu0 %v1111_v6 }
  0x31   :  { %569 = vrot.lane.b32.xlu0 %v59_v0, %s1069_s24  ;;  %571 = vrot.lane.b32.xlu1 %v60_v2, %s1069_s24 }
  0x32   :  { %859 = vmatmul.mubr.msk.f32.gmra.mxu0 %vm78_vm0, %v64_v8 }
  0x33   :  { %861 = vmatprep.mubr.msk.f32.mxu0 %vm78_vm0, %v65_v10  ;;  %889 = vmatpush3.msra.mxu0 %v1111_v6 }
  0x34   :  { %890 = vmatprep.subr.mxu0 %v1118_v9 }
  0x35   :  { %407 = vrot.lane.b32.xlu0 %v61_v1, %s1068_s1  ;;  %409 = vrot.lane.b32.xlu1 %v62_v3, %s1068_s1 }
  0x36   :  { %862 = vmatmul.mubr.msk.f32.gmra.mxu0 %vm78_vm0, %v66_v11 }
  0x37   :  { %891 = vmatpush3.msra.mxu0 %v1118_v9 }
  0x39   :  { %573 = vrot.lane.b32.xlu0 %v61_v1, %s1069_s24  ;;  %575 = vrot.lane.b32.xlu1 %v62_v3, %s1069_s24 }
  0x3d   :  { %411 = vrot.lane.b32.xlu0 %v63_v7, %s1068_s1  ;;  %413 = vrot.lane.b32.xlu1 %v64_v8, %s1068_s1 }
  0x41   :  { %577 = vrot.lane.b32.xlu0 %v63_v7, %s1069_s24  ;;  %579 = vrot.lane.b32.xlu1 %v64_v8, %s1069_s24 }
  0x45   :  { %415 = vrot.lane.b32.xlu0 %v65_v10, %s1068_s1  ;;  %417 = vrot.lane.b32.xlu1 %v66_v11, %s1068_s1 }
  0x49   :  { %581 = vrot.lane.b32.xlu0 %v65_v10, %s1069_s24  ;;  %583 = vrot.lane.b32.xlu1 %v66_v11, %s1069_s24 }
  0x8f   :  { %v238_v12 = vpop.permute.xlu0 %237  ;;  %v242_v13 = vpop.permute.xlu1 %241 }
  0x90   :  { %872 = vmatprep.mubr.msk.f32.mxu1 %vm78_vm0, %v238_v12 }
  0x93   :  { %v240_v14 = vpop.permute.xlu0 %239  ;;  %v244_v15 = vpop.permute.xlu1 %243 }
  0x94   :  { %873 = vmatmul.mubr.msk.f32.vlgmr.msra.gmra.mxu1 %vm78_vm0, %v240_v14 }
  0x95   :  { %875 = vmatprep.mubr.msk.f32.mxu1 %vm78_vm0, %v242_v13  ;;  %905 = vmatpush3.msra.mxu1 %v1100_v4 }
  0x96   :  { %906 = vmatprep.subr.mxu1 %v1104_v5 }
  0x97   :  { %v246_v16 = vpop.permute.xlu0 %245  ;;  %v248_v17 = vpop.permute.xlu1 %247  ;;  %907 = vmatpush3.msra.mxu1 %v1104_v5 }
  0x98   :  { %876 = vmatmul.mubr.msk.f32.gmra.mxu1 %vm78_vm0, %v244_v15  ;;  %908 = vmatprep.subr.mxu1 %v1111_v6 }
  0x99   :  { %878 = vmatprep.mubr.msk.f32.mxu1 %vm78_vm0, %v246_v16  ;;  %909 = vmatpush3.msra.mxu1 %v1111_v6 }
  0x9a   :  { %910 = vmatprep.subr.mxu1 %v1118_v9 }
  0x9b   :  { %v250_v18 = vpop.permute.xlu0 %249  ;;  %v252_v19 = vpop.permute.xlu1 %251  ;;  %911 = vmatpush3.msra.mxu1 %v1118_v9 }
  0x9c   :  { %879 = vmatmul.mubr.msk.f32.gmra.mxu1 %vm78_vm0, %v248_v17 }
  0x9d   :  { %881 = vmatprep.mubr.msk.f32.mxu1 %vm78_vm0, %v250_v18 }
  0x9f   :  { %v404_v20 = vpop.permute.xlu0 %403  ;;  %v406_v21 = vpop.permute.xlu1 %405 }
  0xa0   :  { %882 = vmatmul.mubr.msk.f32.gmra.mxu1 %vm78_vm0, %v252_v19  ;;  %892 = vmatprep.mubr.msk.f32.mxu0 %vm78_vm0, %v404_v20 }
  0xa1   :  { %893 = vmatmul.mubr.msk.f32.vlgmr.msra.gmra.mxu0 %vm78_vm0, %v406_v21 }
  0xa3   :  { %v570_v22 = vpop.permute.xlu0 %569  ;;  %v572_v23 = vpop.permute.xlu1 %571 }
  0xa4   :  { %912 = vmatprep.mubr.msk.f32.mxu1 %vm78_vm0, %v570_v22 }
  0xa5   :  { %913 = vmatmul.mubr.msk.f32.vlgmr.msra.gmra.mxu1 %vm78_vm0, %v572_v23 }
  0xa7   :  { %v408_v24 = vpop.permute.xlu0 %407  ;;  %v410_v25 = vpop.permute.xlu1 %409 }
  0xa8   :  { %895 = vmatprep.mubr.msk.f32.mxu0 %vm78_vm0, %v408_v24 }
  0xa9   :  { %896 = vmatmul.mubr.msk.f32.gmra.mxu0 %vm78_vm0, %v410_v25 }
  0xab   :  { %v574_v26 = vpop.permute.xlu0 %573  ;;  %v576_v27 = vpop.permute.xlu1 %575 }
  0xac   :  { %915 = vmatprep.mubr.msk.f32.mxu1 %vm78_vm0, %v574_v26 }
  0xad   :  { %916 = vmatmul.mubr.msk.f32.gmra.mxu1 %vm78_vm0, %v576_v27 }
  0xaf   :  { %v412_v28 = vpop.permute.xlu0 %411  ;;  %v414_v29 = vpop.permute.xlu1 %413 }
  0xb0   :  { %898 = vmatprep.mubr.msk.f32.mxu0 %vm78_vm0, %v412_v28 }
  0xb1   :  { %899 = vmatmul.mubr.msk.f32.gmra.mxu0 %vm78_vm0, %v414_v29 }
  0xb3   :  { %v578_v30 = vpop.permute.xlu0 %577  ;;  %v580_v31 = vpop.permute.xlu1 %579 }
  0xb4   :  { %918 = vmatprep.mubr.msk.f32.mxu1 %vm78_vm0, %v578_v30 }
  0xb5   :  { %919 = vmatmul.mubr.msk.f32.gmra.mxu1 %vm78_vm0, %v580_v31 }
  0xb7   :  { %v416_v32 = vpop.permute.xlu0 %415  ;;  %v418_v33 = vpop.permute.xlu1 %417 }
  0xb8   :  { %901 = vmatprep.mubr.msk.f32.mxu0 %vm78_vm0, %v416_v32 }
  0xb9   :  { %902 = vmatmul.mubr.msk.f32.gmra.mxu0 %vm78_vm0, %v418_v33 }
  0xbb   :  { %v582_v34 = vpop.permute.xlu0 %581  ;;  %v584_v35 = vpop.permute.xlu1 %583 }
  0xbc   :  { %921 = vmatprep.mubr.msk.f32.mxu1 %vm78_vm0, %v582_v34 }
  0xbd   :  { %922 = vmatmul.mubr.msk.f32.gmra.mxu1 %vm78_vm0, %v584_v35 }
  0xea   :  { %v854_v37 = vpop.f32.mrf.mxu0 }
  0xeb   :  { %v175_v43 = vadd.f32 %v854_v37, %v1182_v41 }
  0xec   :  { %v169_v38 = vpop.f32.mrf.mxu0 }
  0xed   :  { %v170_v44 = vadd.f32 %v1182_v41, %v169_v38  ;;  %933 = vtanh.f32 %v175_v43 }
  0xee   :  { %v857_v39 = vpop.f32.mrf.mxu0 }
  0xef   :  { %935 = vtanh.f32 %v170_v44  ;;  %v185_v55 = vadd.f32 %v857_v39, %v1182_v41 }
  0xf0   :  { %v179_v40 = vpop.f32.mrf.mxu0 }
  0xf1   :  { %v180_v46 = vadd.f32 %v1182_v41, %v179_v40 }
  0xf2   :  { %v860_v42 = vpop.f32.mrf.mxu0 }
  0xf3   :  { %937 = vtanh.f32 %v180_v46  ;;  %v195_v2 = vadd.f32 %v860_v42, %v1182_v41 }
  0xf4   :  { %v189_v47 = vpop.f32.mrf.mxu0 }
  0xf5   :  { %v190_v60 = vadd.f32 %v1182_v41, %v189_v47 }
  0xf6   :  { %v863_v52 = vpop.f32.mrf.mxu0 }
  0xf7   :  { %v205_v4 = vadd.f32 %v863_v52, %v1182_v41 }
  0xf8   :  { %v199_v57 = vpop.f32.mrf.mxu0 }
  0xf9   :  { %v200_v5 = vadd.f32 %v1182_v41, %v199_v57 }
  0xfa   :  { %v934_v1 = vpop.eup %933 }
  0xfb   :  { %v217_v11 = vsel %vm78_vm0, %v934_v1, 0.0 }
  0xfc   :  { %v936_v3 = vpop.eup %935 }
  0xfd   :  { %v216_v12 = vsel %vm78_vm0, %v936_v3, 0.0 }
  0xfe   :  { %v218_v20 = vadd.f32 %v217_v11, %v216_v12 }
 0x100   :  { %v938_v8 = vpop.eup %937 }
 0x101   :  { %v219_v23 = vsel %vm78_vm0, %v938_v8, 0.0 }
 0x102   :  { %v220_v34 = vadd.f32 %v219_v23, %v218_v20 }
 0x154   :  { %v874_v45 = vpop.f32.mrf.mxu1 }
 0x155   :  { %v341_v49 = vadd.f32 %v874_v45, %v1182_v41 }
 0x156   :  { %v335_v48 = vpop.f32.mrf.mxu1 }
 0x157   :  { %v336_v50 = vadd.f32 %v1182_v41, %v335_v48 }
 0x158   :  { %v877_v51 = vpop.f32.mrf.mxu1 }
 0x159   :  { %939 = vtanh.f32 %v336_v50  ;;  %v351_v58 = vadd.f32 %v877_v51, %v1182_v41 }
 0x15a   :  { %v345_v53 = vpop.f32.mrf.mxu1  ;;  %941 = vtanh.f32 %v341_v49 }
 0x15b   :  { %v346_v54 = vadd.f32 %v1182_v41, %v345_v53 }
 0x15c   :  { %v880_v56 = vpop.f32.mrf.mxu1 }
 0x15d   :  { %943 = vtanh.f32 %v346_v54  ;;  %v361_v9 = vadd.f32 %v880_v56, %v1182_v41 }
 0x15e   :  { %v355_v59 = vpop.f32.mrf.mxu1  ;;  %945 = vtanh.f32 %v185_v55 }
 0x15f   :  { %v356_v61 = vadd.f32 %v1182_v41, %v355_v59  ;;  %947 = vtanh.f32 %v351_v58 }
 0x160   :  { %v883_v62 = vpop.f32.mrf.mxu1  ;;  %949 = vtanh.f32 %v190_v60 }
 0x161   :  { %v894_v63 = vpop.f32.mrf.mxu0  ;;  %951 = vtanh.f32 %v356_v61  ;;  %v371_v24 = vadd.f32 %v883_v62, %v1182_v41 }
 0x162   :  { %v365_v0 = vpop.f32.mrf.mxu1  ;;  %953 = vtanh.f32 %v195_v2  ;;  %v507_v16 = vadd.f32 %v894_v63, %v1182_v41 }
 0x163   :  { %v501_v6 = vpop.f32.mrf.mxu0  ;;  %v366_v13 = vadd.f32 %v1182_v41, %v365_v0  ;;  %955 = vtanh.f32 %v205_v4 }
 0x164   :  { %v502_v15 = vadd.f32 %v1182_v41, %v501_v6  ;;  %957 = vtanh.f32 %v200_v5 }
 0x165   :  { %v914_v7 = vpop.f32.mrf.mxu1  ;;  %959 = vtanh.f32 %v361_v9 }
 0x166   :  { %v940_v10 = vpop.eup %939  ;;  %961 = vtanh.f32 %v366_v13  ;;  %v673_v31 = vadd.f32 %v914_v7, %v1182_v41 }
 0x167   :  { %v942_v14 = vpop.eup %941  ;;  %v667_v17 = vpop.f32.mrf.mxu1  ;;  %v382_v21 = vsel %vm78_vm0, %v940_v10, 0.0  ;;  %963 = vtanh.f32 %v502_v15 }
 0x168   :  { %v383_v22 = vsel %vm78_vm0, %v942_v14, 0.0  ;;  %v668_v27 = vadd.f32 %v1182_v41, %v667_v17  ;;  %965 = vtanh.f32 %v507_v16 }
 0x169   :  { %v897_v18 = vpop.f32.mrf.mxu0  ;;  %v384_v30 = vadd.f32 %v383_v22, %v382_v21 }
 0x16a   :  { %v944_v19 = vpop.eup %943  ;;  %v517_v39 = vadd.f32 %v897_v18, %v1182_v41 }
 0x16b   :  { %v511_v25 = vpop.f32.mrf.mxu0  ;;  %v385_v26 = vsel %vm78_vm0, %v944_v19, 0.0  ;;  %v946_v29 = vpop.eup %945 }
 0x16c   :  { %v512_v28 = vadd.f32 %v1182_v41, %v511_v25  ;;  %v948_v33 = vpop.eup %947  ;;  %v386_v35 = vadd.f32 %v385_v26, %v384_v30  ;;  %v221_v38 = vsel %vm78_vm0, %v946_v29, 0.0 }
 0x16d   :  { %v917_v32 = vpop.f32.mrf.mxu1  ;;  %v950_v37 = vpop.eup %949  ;;  %v387_v44 = vsel %vm78_vm0, %v948_v33, 0.0  ;;  %v222_v45 = vadd.f32 %v221_v38, %v220_v34 }
 0x16e   :  { %967 = vtanh.f32 %v512_v28  ;;  %v952_v42 = vpop.eup %951  ;;  %v223_v46 = vsel %vm78_vm0, %v950_v37, 0.0  ;;  %v388_v47 = vadd.f32 %v387_v44, %v386_v35  ;;  %v683_v51 = vadd.f32 %v917_v32, %v1182_v41 }
 0x16f   :  { %969 = vtanh.f32 %v371_v24  ;;  %v677_v36 = vpop.f32.mrf.mxu1  ;;  %v954_v49 = vpop.eup %953  ;;  %v389_v50 = vsel %vm78_vm0, %v952_v42, 0.0  ;;  %v224_v58 = vadd.f32 %v223_v46, %v222_v45 }
 0x170   :  { %971 = vtanh.f32 %v668_v27  ;;  %v678_v40 = vadd.f32 %v1182_v41, %v677_v36  ;;  %v956_v53 = vpop.eup %955  ;;  %v390_v59 = vadd.f32 %v389_v50, %v388_v47  ;;  %v225_v62 = vsel %vm78_vm0, %v954_v49, 0.0 }
 0x171   :  { %973 = vtanh.f32 %v673_v31  ;;  %v900_v43 = vpop.f32.mrf.mxu0  ;;  %v958_v56 = vpop.eup %957  ;;  %v226_v7 = vadd.f32 %v225_v62, %v224_v58  ;;  %v229_v26 = vsel %vm78_vm0, %v956_v53, 0.0 }
 0x172   :  { %975 = vtanh.f32 %v678_v40  ;;  %v527_v54 = vadd.f32 %v900_v43, %v1182_v41  ;;  %v960_v57 = vpop.eup %959  ;;  %v227_v8 = vsel %vm78_vm0, %v958_v56, 0.0 }
 0x173   :  { %v521_v48 = vpop.f32.mrf.mxu0  ;;  %977 = vtanh.f32 %v517_v39  ;;  %v962_v61 = vpop.eup %961  ;;  %v391_v4 = vsel %vm78_vm0, %v960_v57, 0.0  ;;  %v228_v22 = vadd.f32 %v227_v8, %v226_v7 }
 0x174   :  { %v522_v52 = vadd.f32 %v1182_v41, %v521_v48  ;;  %v964_v1 = vpop.eup %963  ;;  %v392_v9 = vadd.f32 %v391_v4, %v390_v59  ;;  %v393_v12 = vsel %vm78_vm0, %v962_v61, 0.0 }
 0x175   :  { %v920_v55 = vpop.f32.mrf.mxu1  ;;  %v966_v3 = vpop.eup %965  ;;  %v548_v13 = vsel %vm78_vm0, %v964_v1, 0.0  ;;  %v230_v35 = vadd.f32 %v229_v26, %v228_v22 }
 0x176   :  { %979 = vtanh.f32 %v522_v52  ;;  %v693_v63 = vadd.f32 %v920_v55, %v1182_v41  ;;  %v549_v18 = vsel %vm78_vm0, %v966_v3, 0.0  ;;  %v394_v23 = vadd.f32 %v393_v12, %v392_v9 }
 0x177   :  { %v687_v60 = vpop.f32.mrf.mxu1  ;;  %981 = vtanh.f32 %v683_v51  ;;  %v550_v24 = vadd.f32 %v549_v18, %v548_v13  ;;  %v231_v45 = vrot.slane %v230_v35, 4 }
 0x178   :  { %v688_v0 = vadd.f32 %v1182_v41, %v687_v60  ;;  %983 = vtanh.f32 %v527_v54 }
 0x179   :  { %v903_v2 = vpop.f32.mrf.mxu0  ;;  %v232_v55 = vadd.f32 %v231_v45, %v230_v35 }
 0x17a   :  { %985 = vtanh.f32 %v688_v0  ;;  %v537_v5 = vadd.f32 %v903_v2, %v1182_v41 }
 0x17b   :  { %v968_v6 = vpop.eup %967  ;;  %v531_v10 = vpop.f32.mrf.mxu0  ;;  %987 = vtanh.f32 %v693_v63  ;;  %v233_v1 = vrot.slane %v232_v55, 2 }
 0x17c   :  { %v970_v11 = vpop.eup %969  ;;  %v532_v14 = vadd.f32 %v1182_v41, %v531_v10  ;;  %989 = vtanh.f32 %v537_v5  ;;  %v551_v19 = vsel %vm78_vm0, %v968_v6, 0.0 }
 0x17d   :  { %v972_v15 = vpop.eup %971  ;;  %v923_v16 = vpop.f32.mrf.mxu1  ;;  %v552_v30 = vadd.f32 %v551_v19, %v550_v24  ;;  %v395_v31 = vsel %vm78_vm0, %v970_v11, 0.0  ;;  %v234_v11 = vadd.f32 %v233_v1, %v232_v55 }
 0x17e   :  { %v974_v17 = vpop.eup %973  ;;  %991 = vtanh.f32 %v532_v14  ;;  %v703_v20 = vadd.f32 %v923_v16, %v1182_v41  ;;  %v714_v27 = vsel %vm78_vm0, %v972_v15, 0.0  ;;  %v396_v36 = vadd.f32 %v395_v31, %v394_v23 }
 0x17f   :  { %v976_v21 = vpop.eup %975  ;;  %v697_v25 = vpop.f32.mrf.mxu1  ;;  %v715_v32 = vsel %vm78_vm0, %v974_v17, 0.0  ;;  %v235_v15 = vrot.slane %v234_v11, 1 }
 0x180   :  { %v698_v28 = vadd.f32 %v1182_v41, %v697_v25  ;;  %v978_v29 = vpop.eup %977  ;;  %993 = vtanh.f32 %v703_v20  ;;  %v717_v33 = vsel %vm78_vm0, %v976_v21, 0.0  ;;  %v716_v37 = vadd.f32 %v715_v32, %v714_v27  ;;  %v735_v27 = vld [vmem:[#allocation7] sm:$0xf] }
 0x181   :  { %v553_v38 = vsel %vm78_vm0, %v978_v29, 0.0  ;;  %v397_v46 = vrot.slane %v396_v36, 4  ;;  %v236_v21 = vadd.f32 %v235_v15, %v234_v11 }
 0x182   :  { %995 = vtanh.f32 %v698_v28  ;;  %v718_v41 = vadd.f32 %v717_v33, %v716_v37  ;;  %v554_v42 = vadd.f32 %v553_v38, %v552_v30 }
 0x183   :  { %v980_v34 = vpop.eup %979  ;;  %v398_v56 = vadd.f32 %v397_v46, %v396_v36 }
 0x184   :  { %v555_v39 = vsel %vm78_vm0, %v980_v34, 0.0  ;;  %v982_v40 = vpop.eup %981 }
 0x185   :  { %v984_v43 = vpop.eup %983  ;;  %v556_v47 = vadd.f32 %v555_v39, %v554_v42  ;;  %v719_v48 = vsel %vm78_vm0, %v982_v40, 0.0  ;;  %v399_v2 = vrot.slane %v398_v56, 2 }
 0x186   :  { %v720_v51 = vadd.f32 %v719_v48, %v718_v41  ;;  %v557_v53 = vsel %vm78_vm0, %v984_v43, 0.0 }
 0x187   :  { %v986_v44 = vpop.eup %985  ;;  %v558_v58 = vadd.f32 %v557_v53, %v556_v47  ;;  %v400_v12 = vadd.f32 %v399_v2, %v398_v56 }
 0x188   :  { %v721_v49 = vsel %vm78_vm0, %v986_v44, 0.0  ;;  %v988_v50 = vpop.eup %987 }
 0x189   :  { %v990_v52 = vpop.eup %989  ;;  %v722_v57 = vadd.f32 %v721_v49, %v720_v51  ;;  %v723_v62 = vsel %vm78_vm0, %v988_v50, 0.0  ;;  %v401_v16 = vrot.slane %v400_v12, 1 }
 0x18a   :  { %v561_v63 = vsel %vm78_vm0, %v990_v52, 0.0 }
 0x18b   :  { %v992_v54 = vpop.eup %991  ;;  %v724_v4 = vadd.f32 %v723_v62, %v722_v57  ;;  %v402_v22 = vadd.f32 %v401_v16, %v400_v12 }
 0x18c   :  { %v559_v59 = vsel %vm78_vm0, %v992_v54, 0.0 }
 0x18d   :  { %v560_v60 = vadd.f32 %v559_v59, %v558_v58  ;;  %v994_v61 = vpop.eup %993  ;;  %v737_v28 = vsel %vm736_vm2, %v236_v21, %v402_v22 }
 0x18e   :  { %v727_v8 = vsel %vm78_vm0, %v994_v61, 0.0 }
 0x18f   :  { %v996_v0 = vpop.eup %995  ;;  %v562_v3 = vadd.f32 %v561_v63, %v560_v60 }
 0x190   :  { %v725_v5 = vsel %vm78_vm0, %v996_v0, 0.0 }
 0x191   :  { %v563_v6 = vrot.slane %v562_v3, 4  ;;  %v726_v7 = vadd.f32 %v725_v5, %v724_v4 }
 0x193   :  { %v564_v9 = vadd.f32 %v563_v6, %v562_v3  ;;  %v728_v10 = vadd.f32 %v727_v8, %v726_v7 }
 0x195   :  { %v729_v13 = vrot.slane %v728_v10, 4  ;;  %v565_v14 = vrot.slane %v564_v9, 2 }
 0x197   :  { %v566_v17 = vadd.f32 %v565_v14, %v564_v9  ;;  %v730_v18 = vadd.f32 %v729_v13, %v728_v10 }
 0x199   :  { %v567_v19 = vrot.slane %v566_v17, 1  ;;  %v731_v20 = vrot.slane %v730_v18, 2 }
 0x19b   :  { %v732_v23 = vadd.f32 %v731_v20, %v730_v18  ;;  %v568_v24 = vadd.f32 %v567_v19, %v566_v17 }
 0x19d   :  { %v733_v25 = vrot.slane %v732_v23, 1  ;;  %v739_v29 = vsel %vm738_vm3, %v737_v28, %v568_v24 }
 0x19f   :  { %v734_v26 = vadd.f32 %v733_v25, %v732_v23 }
 0x1a1   :  { %v741_v30 = vsel %vm740_vm4, %v739_v29, %v734_v26 }
 0x1a2   :  { %v742_v31 = vadd.f32 %v741_v30, %v735_v27 }
 0x1a4   :  { %744 = vst.msk [vmem:[#allocation7] sm:$0xf] %vm57_vm1, %v742_v31 }
 0x1a5   :  { %1048 = shalt.err (!%p1045_p0)
}
 0x1a6   :  { %754 = dma.vmem_to_hbm [thread:$0]  %s752_s27, 64, %s1255_s3, [#allocation4]  }
 0x1a7   :  { %1061 = dma.done.wait [#allocation4], 64  }
 0x1a8   :  { %1062 = vsyncadd [#allocation4], 4294967232 }
 0x1a9   :  { %758 = vsyncpa [#allocation3], 1 }
 0x1aa   :  { %759 = vsyncpa [#allocation6], 1 }
 0x1ab   :  { %760 = vsyncpa [#allocation4], 1 }

</bundles_post_ra>
